<compile_context>
chip_gen: v7x
topology: tpu7x:2x2x1
jax: 0.10.0
libtpu: 0.0.40
codegen_flags: <defaults>
</compile_context>

<pallas_src>
import functools

import jax
import jax.numpy as jnp
from jax.experimental import pallas as pl
from jax.experimental.pallas import tpu as pltpu


def _linear_kernel(x_ref, w_ref, b_ref, o_ref):
    # x_ref: (TM, D)  w_ref: (C, D)  b_ref: (1, C)  o_ref: (TM, C)
    # logits = x @ W.T + b  -> contract dim 1 of both operands (no HBM transpose).
    acc = jax.lax.dot_general(
        x_ref[...], w_ref[...],
        dimension_numbers=(((1,), (1,)), ((), ())),
        preferred_element_type=jnp.float32)
    o_ref[...] = (acc + b_ref[...]).astype(o_ref.dtype)


def _cdiv(a, b):
    return -(-a // b)


def _round_up(v, m):
    return _cdiv(v, m) * m


@functools.lru_cache(maxsize=None)
def _tpu_params():
    """Per-generation VMEM budget / tile targets (conservative on failure)."""
    vmem_cap = 64 * 1024 * 1024  # assume the smallest (v7x-sized) VMEM
    try:
        info = pltpu.get_tpu_info()
        cap = getattr(info, "vmem_capacity_bytes", None)
        if cap:
            vmem_cap = int(cap)
    except Exception:
        pass
    if vmem_cap >= 128 * 1024 * 1024:
        # v5e / v6e: 128 MiB physical VMEM, single TensorCore per chip.
        return {"budget": 72 << 20, "vmem_limit": 96 << 20,
                "target_tile": 2 << 20, "min_steps": 1}
    # v7x (64 MiB VMEM per TC, 2 TCs) or unknown: stay well under 64 MiB and
    # make the parallel grid axis >= 2 steps so both TensorCores get work.
    return {"budget": 40 << 20, "vmem_limit": 48 << 20,
            "target_tile": 4 << 20, "min_steps": 2}


def _pick_row_tile(n, d, c, x_item, w_item, out_item, *, budget_bytes,
                   target_tile_bytes, granule, sublane, min_steps):
    """Row tile with BOTH a lower bound (>= target_tile_bytes of x per tile so
    the ~0.35us grid-step overhead is amortized) and a VMEM upper bound
    (double-buffered x/out tiles + single-buffered weight/bias)."""
    n_cap = _round_up(n, sublane)
    const_bytes = d * c * w_item + 2 * c * 4          # weight (1x) + bias
    avail = max(budget_bytes - const_bytes, 0)
    per_row = 2 * (d * x_item + c * out_item)         # 2x-buffered x & out rows
    tm_vmem = max((avail // per_row) // sublane * sublane, sublane)
    tm_target = _round_up(_cdiv(target_tile_bytes, d * x_item), granule)
    tm = max(min(n_cap, tm_target, tm_vmem), sublane)
    tm = _round_up(tm, sublane)
    # Megacore (v7x): ensure at least `min_steps` tiles on the parallel axis.
    if min_steps > 1 and n_cap > sublane * min_steps and _cdiv(n_cap, tm) < min_steps:
        tm = _round_up(_cdiv(n_cap, min_steps), sublane)
    return int(tm)


@functools.lru_cache(maxsize=None)
def _get_call(n, d, c, tm, x_dtype_name, out_dtype_name, vmem_limit,
              single_buffer_consts):
    x_dtype = jnp.dtype(x_dtype_name)
    out_dtype = jnp.dtype(out_dtype_name)
    x_item = x_dtype.itemsize
    grid = (_cdiv(n, tm),)

    cost = pl.CostEstimate(
        flops=2 * n * d * c,
        transcendentals=0,
        bytes_accessed=(n * d * x_item + c * d * x_item + c * 4
                        + n * c * out_dtype.itemsize),
    )

    # Weight/bias have constant index_maps -> DMA'd once; a second pipeline
    # buffer for them is pure VMEM waste, so request a single buffer.
    const_kw = {"pipeline_mode": pl.Buffered(1)} if single_buffer_consts else {}

    call = pl.pallas_call(
        _linear_kernel,
        out_shape=jax.ShapeDtypeStruct((n, c), out_dtype),
        grid_spec=pltpu.PrefetchScalarGridSpec(
            num_scalar_prefetch=0,
            grid=grid,
            in_specs=[
                # Row tile of x; full D extent (== array dim -> no padding).
                pl.BlockSpec((tm, d), lambda i: (i, 0)),
                # Full weight in PyTorch (C, D) layout, constant block index.
                pl.BlockSpec((c, d), lambda i: (0, 0), **const_kw),
                # Bias row, constant block index.
                pl.BlockSpec((1, c), lambda i: (0, 0), **const_kw),
            ],
            out_specs=pl.BlockSpec((tm, c), lambda i: (i, 0)),
        ),
        compiler_params=pltpu.CompilerParams(
            dimension_semantics=("parallel",),
            vmem_limit_bytes=int(vmem_limit),
        ),
        cost_estimate=cost,
    )
    return jax.jit(call)


_SINGLE_BUFFER_CONSTS_OK = None  # resolved on first call (Buffered(1) probe)


def logistic_regression_forward(x, weight, bias):
    """logits = x @ weight.T + bias  (nn.Linear semantics, f32 accumulation).

    x: (N, D) float32 or bfloat16 (pass bf16 activations upstream to halve the
    dominant HBM stream -- no wrapper-side cast of x is performed).
    weight: (C, D) PyTorch layout.  bias: (C,).  Returns (N, C) float32.
    """
    n, d = x.shape
    c = weight.shape[0]

    w_in = weight if weight.dtype == x.dtype else weight.astype(x.dtype)
    b_in = bias.astype(jnp.float32).reshape(1, c)
    out_dtype = jnp.float32

    params = _tpu_params()
    x_item = jnp.dtype(x.dtype).itemsize
    out_item = jnp.dtype(out_dtype).itemsize
    sublane = max(8, 32 // x_item)  # 8 for f32, 16 for bf16, 32 for fp8/int8

    tm = _pick_row_tile(n, d, c, x_item, x_item, out_item,
                        budget_bytes=params["budget"],
                        target_tile_bytes=params["target_tile"],
                        granule=256, sublane=sublane,
                        min_steps=params["min_steps"])

    global _SINGLE_BUFFER_CONSTS_OK
    modes = ((True, False) if _SINGLE_BUFFER_CONSTS_OK is None
             else (_SINGLE_BUFFER_CONSTS_OK,))
    last_err = None
    for single in modes:
        try:
            fn = _get_call(n, d, c, tm, jnp.dtype(x.dtype).name,
                           jnp.dtype(out_dtype).name, params["vmem_limit"],
                           single)
            out = fn(x, w_in, b_in)
            _SINGLE_BUFFER_CONSTS_OK = single
            return out
        except Exception as e:  # fall back to default double-buffered consts
            last_err = e
    raise last_err


def init_linear_params(key, num_dim, num_class, dtype=jnp.float32):
    """Deterministic init matching nn.Linear default: U(-1/sqrt(D), 1/sqrt(D))."""
    k_w, k_b = jax.random.split(key)
    bound = 1.0 / jnp.sqrt(jnp.asarray(num_dim, dtype))
    weight = jax.random.uniform(k_w, (num_class, num_dim), dtype,
                                minval=-bound, maxval=bound)
    bias = jax.random.uniform(k_b, (num_class,), dtype,
                              minval=-bound, maxval=bound)
    return weight, bias


if __name__ == "__main__":
    key = jax.random.PRNGKey(0)
    k_x, k_p = jax.random.split(key)

    num_nodes = 16   # N (rows of x); the "g" graph arg is unused by forward
    num_dim = 32     # input feature dim
    num_class = 8    # number of classes

    x = jax.random.normal(k_x, (num_nodes, num_dim), jnp.float32)
    weight, bias = init_linear_params(k_p, num_dim, num_class)

    ref = x @ weight.T + bias

    # f32 path (exact nn.Linear semantics).
    logits = logistic_regression_forward(x, weight, bias)
    jax.block_until_ready(logits)
    assert logits.shape == (num_nodes, num_class)
    assert jnp.allclose(logits, ref, atol=1e-5, rtol=1e-5)

    # bf16 activations (cast happens upstream, kernel streams bf16 directly).
    x_bf16 = x.astype(jnp.bfloat16)
    logits_bf16 = logistic_regression_forward(x_bf16, weight, bias)
    jax.block_until_ready(logits_bf16)
    assert jnp.allclose(logits_bf16, ref, atol=5e-2, rtol=5e-2)

    # TODO(synk): fp8 x/W path on v7x could quarter the x stream if accuracy allows.
    print("KERNEL_OK")
</pallas_src>

<mosaic_0001>
module attributes {stable_mosaic.version = 11 : i64} {
  func.func @_linear_kernel(%arg0: i32, %arg1: memref<16x32xf32, #tpu.memory_space<vmem>>, %arg2: memref<8x32xf32, #tpu.memory_space<vmem>>, %arg3: memref<1x8xf32, #tpu.memory_space<vmem>>, %arg4: memref<16x8xf32, #tpu.memory_space<vmem>>) attributes {dimension_semantics = [#tpu.dimension_semantics<parallel>], iteration_bounds = array<i64: 1>, scalar_prefetch = 0 : i64, scratch_operands = 0 : i64, tpu.core_type = #tpu.core_type<tc>, window_params = [{transform_indices = @transform_0, window_bounds = array<i64: 16, 32>}, {pipeline_mode = #tpu.pipeline_mode<synchronous>, transform_indices = @transform_1, window_bounds = array<i64: 8, 32>}, {pipeline_mode = #tpu.pipeline_mode<synchronous>, transform_indices = @transform_2, window_bounds = array<i64: 1, 8>}, {transform_indices = @transform_3, window_bounds = array<i64: 16, 8>}]} {
    %c0 = arith.constant 0 : index
    %c0_0 = arith.constant 0 : index
    %0 = vector.load %arg1[%c0, %c0_0] : memref<16x32xf32, #tpu.memory_space<vmem>>, vector<16x32xf32>
    %c0_1 = arith.constant 0 : index
    %c0_2 = arith.constant 0 : index
    %1 = vector.load %arg2[%c0_1, %c0_2] : memref<8x32xf32, #tpu.memory_space<vmem>>, vector<8x32xf32>
    %cst = arith.constant dense<0.000000e+00> : vector<16x8xf32>
    %2 = tpu.matmul %0, %1, %cst {dimension_numbers = #tpu.dot_dimension_numbers<[1], [1], [0], [0], [0, 0, 1, 0], [], []>} : vector<16x32xf32>, vector<8x32xf32>, vector<16x8xf32> -> vector<16x8xf32>
    %c0_3 = arith.constant 0 : index
    %c0_4 = arith.constant 0 : index
    %3 = vector.load %arg3[%c0_3, %c0_4] : memref<1x8xf32, #tpu.memory_space<vmem>>, vector<1x8xf32>
    %4 = vector.broadcast %3 : vector<1x8xf32> to vector<16x8xf32>
    %5 = arith.addf %2, %4 : vector<16x8xf32>
    %c0_5 = arith.constant 0 : index
    %c0_6 = arith.constant 0 : index
    %6 = vector.load %arg4[%c0_5, %c0_6] : memref<16x8xf32, #tpu.memory_space<vmem>>, vector<16x8xf32>
    tpu.vector_store %arg4[%c0_5, %c0_6], %5 {strides = array<i32>} : memref<16x8xf32, #tpu.memory_space<vmem>>, vector<16x8xf32>,
    return
  }
  func.func @transform_0(%arg0: i32) -> (i32, i32) {
    %c0_i32 = arith.constant 0 : i32
    %c0_i32_0 = arith.constant 0 : i32
    return %arg0, %c0_i32 : i32, i32
  }
  func.func @transform_1(%arg0: i32) -> (i32, i32) {
    %c0_i32 = arith.constant 0 : i32
    %c0_i32_0 = arith.constant 0 : i32
    %c0_i32_1 = arith.constant 0 : i32
    return %c0_i32, %c0_i32_0 : i32, i32
  }
  func.func @transform_2(%arg0: i32) -> (i32, i32) {
    %c0_i32 = arith.constant 0 : i32
    %c0_i32_0 = arith.constant 0 : i32
    %c0_i32_1 = arith.constant 0 : i32
    return %c0_i32, %c0_i32_0 : i32, i32
  }
  func.func @transform_3(%arg0: i32) -> (i32, i32) {
    %c0_i32 = arith.constant 0 : i32
    %c0_i32_0 = arith.constant 0 : i32
    return %arg0, %c0_i32 : i32, i32
  }
}

module attributes {stable_mosaic.version = 11 : i64} {
  func.func @_linear_kernel(%arg0: i32, %arg1: memref<16x32xf32, #tpu.memory_space<vmem>>, %arg2: memref<8x32xf32, #tpu.memory_space<vmem>>, %arg3: memref<1x8xf32, #tpu.memory_space<vmem>>, %arg4: memref<16x8xf32, #tpu.memory_space<vmem>>) attributes {dimension_semantics = [#tpu.dimension_semantics<parallel>], iteration_bounds = array<i64: 1>, scalar_prefetch = 0 : i64, scratch_operands = 0 : i64, tpu.core_type = #tpu.core_type<tc>, window_params = [{transform_indices = @transform_0, window_bounds = array<i64: 16, 32>}, {pipeline_mode = #tpu.pipeline_mode<synchronous>, transform_indices = @transform_1, window_bounds = array<i64: 8, 32>}, {pipeline_mode = #tpu.pipeline_mode<synchronous>, transform_indices = @transform_2, window_bounds = array<i64: 1, 8>}, {transform_indices = @transform_3, window_bounds = array<i64: 16, 8>}]} {
    %c0 = arith.constant 0 : index
    %c0_0 = arith.constant 0 : index
    %0 = vector.load %arg1[%c0, %c0_0] : memref<16x32xf32, #tpu.memory_space<vmem>>, vector<16x32xf32>
    %c0_1 = arith.constant 0 : index
    %c0_2 = arith.constant 0 : index
    %1 = vector.load %arg2[%c0_1, %c0_2] : memref<8x32xf32, #tpu.memory_space<vmem>>, vector<8x32xf32>
    %cst = arith.constant dense<0.000000e+00> : vector<16x8xf32>
    %2 = tpu.matmul %0, %1, %cst {dimension_numbers = #tpu.dot_dimension_numbers<[1], [1], [0], [0], [0, 0, 1, 0], [], []>} : vector<16x32xf32>, vector<8x32xf32>, vector<16x8xf32> -> vector<16x8xf32>
    %c0_3 = arith.constant 0 : index
    %c0_4 = arith.constant 0 : index
    %3 = vector.load %arg3[%c0_3, %c0_4] : memref<1x8xf32, #tpu.memory_space<vmem>>, vector<1x8xf32>
    %4 = vector.broadcast %3 : vector<1x8xf32> to vector<16x8xf32>
    %5 = arith.addf %2, %4 : vector<16x8xf32>
    %c0_5 = arith.constant 0 : index
    %c0_6 = arith.constant 0 : index
    %6 = vector.load %arg4[%c0_5, %c0_6] : memref<16x8xf32, #tpu.memory_space<vmem>>, vector<16x8xf32>
    tpu.vector_store %arg4[%c0_5, %c0_6], %5 {strides = array<i32>} : memref<16x8xf32, #tpu.memory_space<vmem>>, vector<16x8xf32>,
    return
  }
  func.func @transform_0(%arg0: i32) -> (i32, i32) {
    %c0_i32 = arith.constant 0 : i32
    %c0_i32_0 = arith.constant 0 : i32
    return %arg0, %c0_i32 : i32, i32
  }
  func.func @transform_1(%arg0: i32) -> (i32, i32) {
    %c0_i32 = arith.constant 0 : i32
    %c0_i32_0 = arith.constant 0 : i32
    %c0_i32_1 = arith.constant 0 : i32
    return %c0_i32, %c0_i32_0 : i32, i32
  }
  func.func @transform_2(%arg0: i32) -> (i32, i32) {
    %c0_i32 = arith.constant 0 : i32
    %c0_i32_0 = arith.constant 0 : i32
    %c0_i32_1 = arith.constant 0 : i32
    return %c0_i32, %c0_i32_0 : i32, i32
  }
  func.func @transform_3(%arg0: i32) -> (i32, i32) {
    %c0_i32 = arith.constant 0 : i32
    %c0_i32_0 = arith.constant 0 : i32
    return %arg0, %c0_i32 : i32, i32
  }
}

</mosaic_0001>

<bundles_post_ra>
// kernel: tpu_custom_call.1
= control target key start
LH: loop header
LB: loop body
LE: loop exit
PB: predicated region body
PF: predicated region fallthrough
CT: control target
= control target key end

     0   :  { %8 = vsyncpa [#allocation3], 0  ;;  %s265_s0 = inlined_call_operand.hbm [shape: f32[16,32], index: 0, kind: input, shape index: {}]   ;;  %s266_s1 = inlined_call_operand.hbm [shape: f32[8,32], index: 1, kind: input, shape index: {}]   ;;  %s267_s2 = inlined_call_operand.vmem [shape: f32[1,8], index: 2, kind: input, shape index: {}]   ;;  %s268_s3 = inlined_call_operand.vmem [shape: f32[16,8], index: 3, kind: output, shape index: {}]  }
   0x1   :  { %9 = vsyncpa [#allocation5], 0  ;;  %s208_s12 = smov [#allocation2]   ;;  %s160_s16 = scalar_lea.hbm %s265_s0, 256 }
   0x2   :  { %s15_s13 = sshll.u32 %s208_s12, 4  ;;  %p161_p0 = scmp.ne.s32.totalorder %s265_s0, %s160_s16  ;;  %s16_s13 = int_to_ptr.vmem [resolvable:$true] %s15_s13 }
   0x3   :  { %p164_p1 = scmp.lt.u32.totalorder %s160_s16, %s265_s0 }
   0x5   :  { %p166_p2 = pnand %p164_p1, %p161_p0 }
   0x7   :  { %169 = shalt.err (!%p166_p2)
}
   0x8   :  { %s170_s21 = scalar_lea.vmem %s16_s13, 256  ;;  %p175_p4 = scmp.lt.s32.totalorder %s16_s13, %s16_s13 }
   0x9   :  { %p171_p3 = scmp.ne.s32.totalorder %s16_s13, %s170_s21  ;;  %p176_p5 = scmp.lt.s32.totalorder %s170_s21, %s170_s21 }
   0xb   :  { %p177_p6 = por %p176_p5, %p175_p4 }
   0xd   :  { %p178_p7 = pnand %p177_p6, %p171_p3 }
   0xf   :  { %181 = shalt.err (!%p178_p7)
}
  0x10   :  { %s209_s22 = smov 128   ;;  %s210_s23 = smov 8  }
  0x11   :  { %21 = dma.hbm_to_vmem [thread:$0]  %s265_s0, 256, %s16_s13, [#allocation3], %s209_s22, %s209_s22, %s210_s23  }
  0x12   :  { %s211_s26 = smov [#allocation4]   ;;  %s182_s30 = scalar_lea.hbm %s266_s1, 128 }
  0x13   :  { %s28_s27 = sshll.u32 %s211_s26, 4  ;;  %p183_p8 = scmp.ne.s32.totalorder %s266_s1, %s182_s30  ;;  %s29_s27 = int_to_ptr.vmem [resolvable:$true] %s28_s27 }
  0x14   :  { %p186_p9 = scmp.lt.u32.totalorder %s182_s30, %s266_s1 }
  0x16   :  { %p188_p10 = pnand %p186_p9, %p183_p8 }
  0x18   :  { %191 = shalt.err (!%p188_p10)
}
  0x19   :  { %s192_s8 = scalar_lea.vmem %s29_s27, 128  ;;  %p197_p12 = scmp.lt.s32.totalorder %s29_s27, %s29_s27 }
  0x1a   :  { %p193_p11 = scmp.ne.s32.totalorder %s29_s27, %s192_s8  ;;  %p198_p13 = scmp.lt.s32.totalorder %s192_s8, %s192_s8 }
  0x1c   :  { %p199_p0 = por %p198_p13, %p197_p12 }
  0x1e   :  { %p200_p1 = pnand %p199_p0, %p193_p11 }
  0x20   :  { %203 = shalt.err (!%p200_p1)
}
  0x21   :  { %31 = dma.hbm_to_vmem [thread:$0]  %s266_s1, 128, %s29_s27, [#allocation5]  }
  0x22   :  { %204 = dma.done.wait [#allocation3], 256  }
  0x23   :  { %205 = vsyncadd [#allocation3], 4294967040 }
  0x24   :  { %206 = dma.done.wait [#allocation5], 128  }
  0x25   :  { %207 = vsyncadd [#allocation5], 4294967168  ;;  %vm50_vm0 = vcmask 261120   ;;  %v42_v0 = vld [vmem:[#allocation4] sm:$0xff]  ;;  %v40_v1 = vld [vmem:[#allocation2] sm:$0xff]  ;;  %vm135_vm1 = vcmask 64512  }
  0x26   :  { %151 = vmatprep.subr.msk.mxu0 %vm50_vm0, %v42_v0  ;;  %153 = vmatprep.mubr.msk.f32.mxu0 %vm50_vm0, %v40_v1  ;;  %v41_v2 = vld [vmem:[#allocation2 + $0x8] sm:$0xff]  ;;  %v144_v3 = vld [vmem:[%s267_s2] ss:$0 sm:$0xff] }
  0x27   :  { %152 = vmatpush3.xpose.msk.msra.mxu0 %vm50_vm0, %v42_v0 }
  0x2a   :  { %154 = vmatmul.mubr.msk.f32.vlgmr.msra.gmra.mrb[0].mxu0 %vm50_vm0, %v41_v2 }
  0xfd   :  { %v155_v4 = vpop.f32.mrb[0].mxu0 }
  0xfe   :  { %v132_v5 = vadd.f32 %v155_v4, %v144_v3  ;;  %v126_v6 = vpop.f32.mrb[1].mxu0 }
  0xff   :  { %v127_v7 = vadd.f32 %v144_v3, %v126_v6 }
 0x100   :  { %137 = vst.msk [vmem:[%s268_s3 + $0x8] sm:$0xff] %vm135_vm1, %v132_v5 }
 0x101   :  { %136 = vst.msk [vmem:[%s268_s3] sm:$0xff] %vm135_vm1, %v127_v7 }
 0x102   :  { %142 = vsyncpa [#allocation3], 1 }
 0x103   :  { %143 = vsyncpa [#allocation5], 1 }

// kernel: tpu_custom_call.1
= control target key start
LH: loop header
LB: loop body
LE: loop exit
PB: predicated region body
PF: predicated region fallthrough
CT: control target
= control target key end

     0   :  { %8 = vsyncpa [#allocation3], 0  ;;  %s265_s0 = inlined_call_operand.hbm [shape: f32[16,32], index: 0, kind: input, shape index: {}]   ;;  %s266_s1 = inlined_call_operand.hbm [shape: f32[8,32], index: 1, kind: input, shape index: {}]   ;;  %s267_s2 = inlined_call_operand.vmem [shape: f32[1,8], index: 2, kind: input, shape index: {}]   ;;  %s268_s3 = inlined_call_operand.vmem [shape: f32[16,8], index: 3, kind: output, shape index: {}]  }
   0x1   :  { %9 = vsyncpa [#allocation5], 0  ;;  %s208_s12 = smov [#allocation2]   ;;  %s160_s16 = scalar_lea.hbm %s265_s0, 256 }
   0x2   :  { %s15_s13 = sshll.u32 %s208_s12, 4  ;;  %p161_p0 = scmp.ne.s32.totalorder %s265_s0, %s160_s16  ;;  %s16_s13 = int_to_ptr.vmem [resolvable:$true] %s15_s13 }
   0x3   :  { %p164_p1 = scmp.lt.u32.totalorder %s160_s16, %s265_s0 }
   0x5   :  { %p166_p2 = pnand %p164_p1, %p161_p0 }
   0x7   :  { %169 = shalt.err (!%p166_p2)
}
   0x8   :  { %s170_s21 = scalar_lea.vmem %s16_s13, 256  ;;  %p175_p4 = scmp.lt.s32.totalorder %s16_s13, %s16_s13 }
   0x9   :  { %p171_p3 = scmp.ne.s32.totalorder %s16_s13, %s170_s21  ;;  %p176_p5 = scmp.lt.s32.totalorder %s170_s21, %s170_s21 }
   0xb   :  { %p177_p6 = por %p176_p5, %p175_p4 }
   0xd   :  { %p178_p7 = pnand %p177_p6, %p171_p3 }
   0xf   :  { %181 = shalt.err (!%p178_p7)
}
  0x10   :  { %s209_s22 = smov 128   ;;  %s210_s23 = smov 8  }
  0x11   :  { %21 = dma.hbm_to_vmem [thread:$0]  %s265_s0, 256, %s16_s13, [#allocation3], %s209_s22, %s209_s22, %s210_s23  }
  0x12   :  { %s211_s26 = smov [#allocation4]   ;;  %s182_s30 = scalar_lea.hbm %s266_s1, 128 }
  0x13   :  { %s28_s27 = sshll.u32 %s211_s26, 4  ;;  %p183_p8 = scmp.ne.s32.totalorder %s266_s1, %s182_s30  ;;  %s29_s27 = int_to_ptr.vmem [resolvable:$true] %s28_s27 }
  0x14   :  { %p186_p9 = scmp.lt.u32.totalorder %s182_s30, %s266_s1 }
  0x16   :  { %p188_p10 = pnand %p186_p9, %p183_p8 }
  0x18   :  { %191 = shalt.err (!%p188_p10)
}
  0x19   :  { %s192_s8 = scalar_lea.vmem %s29_s27, 128  ;;  %p197_p12 = scmp.lt.s32.totalorder %s29_s27, %s29_s27 }
  0x1a   :  { %p193_p11 = scmp.ne.s32.totalorder %s29_s27, %s192_s8  ;;  %p198_p13 = scmp.lt.s32.totalorder %s192_s8, %s192_s8 }
  0x1c   :  { %p199_p0 = por %p198_p13, %p197_p12 }
  0x1e   :  { %p200_p1 = pnand %p199_p0, %p193_p11 }
  0x20   :  { %203 = shalt.err (!%p200_p1)
}
  0x21   :  { %31 = dma.hbm_to_vmem [thread:$0]  %s266_s1, 128, %s29_s27, [#allocation5]  }
  0x22   :  { %204 = dma.done.wait [#allocation3], 256  }
  0x23   :  { %205 = vsyncadd [#allocation3], 4294967040 }
  0x24   :  { %206 = dma.done.wait [#allocation5], 128  }
  0x25   :  { %207 = vsyncadd [#allocation5], 4294967168  ;;  %vm50_vm0 = vcmask 261120   ;;  %v42_v0 = vld [vmem:[#allocation4] sm:$0xff]  ;;  %v40_v1 = vld [vmem:[#allocation2] sm:$0xff]  ;;  %vm135_vm1 = vcmask 64512  }
  0x26   :  { %151 = vmatprep.subr.msk.mxu0 %vm50_vm0, %v42_v0  ;;  %153 = vmatprep.mubr.msk.f32.mxu0 %vm50_vm0, %v40_v1  ;;  %v41_v2 = vld [vmem:[#allocation2 + $0x8] sm:$0xff]  ;;  %v144_v3 = vld [vmem:[%s267_s2] ss:$0 sm:$0xff] }
  0x27   :  { %152 = vmatpush3.xpose.msk.msra.mxu0 %vm50_vm0, %v42_v0 }
  0x2a   :  { %154 = vmatmul.mubr.msk.f32.vlgmr.msra.gmra.mrb[0].mxu0 %vm50_vm0, %v41_v2 }
  0xfd   :  { %v155_v4 = vpop.f32.mrb[0].mxu0 }
  0xfe   :  { %v132_v5 = vadd.f32 %v155_v4, %v144_v3  ;;  %v126_v6 = vpop.f32.mrb[1].mxu0 }
  0xff   :  { %v127_v7 = vadd.f32 %v144_v3, %v126_v6 }
 0x100   :  { %137 = vst.msk [vmem:[%s268_s3 + $0x8] sm:$0xff] %vm135_vm1, %v132_v5 }
 0x101   :  { %136 = vst.msk [vmem:[%s268_s3] sm:$0xff] %vm135_vm1, %v127_v7 }
 0x102   :  { %142 = vsyncpa [#allocation3], 1 }
 0x103   :  { %143 = vsyncpa [#allocation5], 1 }

</bundles_post_ra>
